<compile_context>
chip_gen: v7x
topology: tpu7x:2x2x1
jax: 0.10.0
libtpu: 0.0.40
codegen_flags: <defaults>
</compile_context>

<pallas_src>
import functools

import jax
import jax.numpy as jnp
import numpy as np
from jax.experimental import pallas as pl
from jax.experimental.pallas import tpu as pltpu

D_IN = 2             # Linear in_features  (fixed by the module)
D_OUT = 2            # Linear out_features (fixed by the module)
N_CAT = 3            # torch.cat([v2, v2, v2], dim=2)
D_CAT = N_CAT * D_OUT  # 6

_LANE = 128
_MAX_TILE = 65536        # lanes per S tile  (>= ~1 MiB DMA/step, ~8 MiB VMEM)
_MIN_SPLIT_TILE = 16384  # don't split S below this just to add grid steps


def _permute_linear_kernel(params_ref, x_ref, o_ref):
    # params_ref: SMEM (6,) f32 = [w00, w01, w10, w11, b0, b1]
    # x_ref:      VMEM (1, D_IN, tS) block  -- one batch element, one S tile
    # o_ref:      VMEM (1, D_OUT, tS) block -- lane-dense (feature-major)
    w00 = params_ref[0]
    w01 = params_ref[1]
    w10 = params_ref[2]
    w11 = params_ref[3]
    b0 = params_ref[4]
    b1 = params_ref[5]

    x = x_ref[0].astype(jnp.float32)        # (D_IN, tS)
    xa = x[0:1, :]                          # (1, tS)
    xb = x[1:2, :]                          # (1, tS)

    # F.linear on the permuted input, computed without the permute:
    # out_feature_o[s] = sum_d W[o, d] * x[d, s] + b[o]   (pure VPU FMAs).
    o_ref[0, 0:1, :] = w00 * xa + w01 * xb + b0
    o_ref[0, 1:2, :] = w10 * xa + w11 * xb + b1


def _choose_tiling(S, batch):
    """Return (S_pad, tS, n_s): padded length, S-tile size, #tiles along S.

    tS is a multiple of 128, capped at _MAX_TILE; padding waste <= tS - 1.
    When batch is tiny, S is split into enough tiles for pipelining / megacore
    as long as each tile still moves a non-trivial amount of data.
    """
    s128 = -(-S // _LANE) * _LANE                 # pad S up to a lane multiple
    n = -(-s128 // _MAX_TILE)                     # tiles needed for the cap
    if batch * n < 4:                             # few grid steps total?
        want = -(-4 // batch)                     # steps wanted along S
        if s128 // want >= _MIN_SPLIT_TILE:       # only if tiles stay big
            n = max(n, want)
    tS = -(-s128 // n)
    tS = -(-tS // _LANE) * _LANE                  # keep multiple of 128
    return n * tS, tS, n


@functools.partial(jax.jit, static_argnames=("layout",))
def permute_linear_cat(x1, weight, bias, layout="lane_dense"):
    """x1: (B, D_IN, S); weight: (D_OUT, D_IN); bias: (D_OUT,).

    Computes linear(permute(x1, (0, 2, 1))).
      layout="lane_dense": returns (B, D_OUT, S) f32 (feature-major, the
                           kernel's native lane-dense layout; preferred).
      layout="torch":      returns cat([v2]*3, -1) as (B, S, 3*D_OUT) f32,
                           matching the PyTorch contract, via ONE fused XLA
                           transpose + tile applied after the kernel.
    """
    B, D, S = x1.shape
    assert D == D_IN
    S_pad, tS, n_s = _choose_tiling(S, B)
    if S_pad != S:
        x1 = jnp.pad(x1, ((0, 0), (0, 0), (0, S_pad - S)))

    params = jnp.concatenate(
        [weight.reshape(-1).astype(jnp.float32),
         bias.reshape(-1).astype(jnp.float32)])            # (6,)

    out = pl.pallas_call(
        _permute_linear_kernel,
        out_shape=jax.ShapeDtypeStruct((B, D_OUT, S_pad), jnp.float32),
        grid_spec=pltpu.PrefetchScalarGridSpec(
            num_scalar_prefetch=0,
            grid=(B, n_s),
            in_specs=[
                pl.BlockSpec(memory_space=pltpu.MemorySpace.SMEM),    # w + b
                pl.BlockSpec((1, D_IN, tS), lambda b, s: (b, 0, s)),  # x tile
            ],
            out_specs=pl.BlockSpec((1, D_OUT, tS), lambda b, s: (b, 0, s)),
        ),
        compiler_params=pltpu.CompilerParams(
            dimension_semantics=("parallel", "parallel"),
            vmem_limit_bytes=32 * 1024 * 1024),
    )(params, x1)

    if S_pad != S:
        out = out[:, :, :S]

    if layout == "lane_dense":
        return out                                  # (B, D_OUT, S)

    # PyTorch contract: v2 = (B, S, 2); cat([v2, v2, v2], -1) -> (B, S, 6).
    v2 = jnp.transpose(out, (0, 2, 1))              # (B, S, D_OUT)
    return jnp.tile(v2, (1, 1, N_CAT))              # (B, S, D_CAT)


# ----------------------------- references ---------------------------------

def reference_lane_dense(x1, weight, bias):
    # (B, D_OUT, S): W @ x + b, feature-major.
    w = weight.astype(jnp.float32)
    return (jnp.einsum("od,bds->bos", w, x1.astype(jnp.float32))
            + bias.astype(jnp.float32)[None, :, None])


def reference_torch(x1, weight, bias):
    v1 = jnp.transpose(x1, (0, 2, 1)).astype(jnp.float32)
    v2 = (jnp.einsum("bsd,od->bso", v1, weight.astype(jnp.float32))
          + bias.astype(jnp.float32))
    return jnp.concatenate([v2, v2, v2], axis=-1)


if __name__ == "__main__":
    key = jax.random.PRNGKey(0)
    kx, kw, kb, kx2, kx3 = jax.random.split(key, 5)

    # Deterministic params mimicking nn.Linear's U(-1/sqrt(fan_in), ...).
    bound = 1.0 / np.sqrt(D_IN)
    weight = jax.random.uniform(kw, (D_OUT, D_IN), jnp.float32, -bound, bound)
    bias = jax.random.uniform(kb, (D_OUT,), jnp.float32, -bound, bound)

    # Case 1: small shape consistent with the module (batch=2, in=2, seq=8).
    B1, S1 = 2, 8
    x_small = jax.random.normal(kx, (B1, D_IN, S1), dtype=jnp.float32)
    out_ld = jax.block_until_ready(permute_linear_cat(x_small, weight, bias))
    assert out_ld.shape == (B1, D_OUT, S1)
    np.testing.assert_allclose(
        np.asarray(out_ld), np.asarray(reference_lane_dense(x_small, weight, bias)),
        rtol=1e-5, atol=1e-5)

    out_torch = jax.block_until_ready(
        permute_linear_cat(x_small, weight, bias, layout="torch"))
    assert out_torch.shape == (B1, S1, D_CAT)
    np.testing.assert_allclose(
        np.asarray(out_torch), np.asarray(reference_torch(x_small, weight, bias)),
        rtol=1e-5, atol=1e-5)

    # Case 2: lane-dense hot path, larger S (multiple of 128, multi-step grid).
    B2, S2 = 1, 4096
    x_big = jax.random.normal(kx2, (B2, D_IN, S2), dtype=jnp.float32)
    out2 = jax.block_until_ready(permute_linear_cat(x_big, weight, bias))
    assert out2.shape == (B2, D_OUT, S2)
    np.testing.assert_allclose(
        np.asarray(out2), np.asarray(reference_lane_dense(x_big, weight, bias)),
        rtol=1e-5, atol=1e-5)

    # Case 3: non-128-multiple S exercises the wrapper padding path.
    B3, S3 = 2, 1000
    x_odd = jax.random.normal(kx3, (B3, D_IN, S3), dtype=jnp.float32)
    out3 = jax.block_until_ready(
        permute_linear_cat(x_odd, weight, bias, layout="torch"))
    assert out3.shape == (B3, S3, D_CAT)
    np.testing.assert_allclose(
        np.asarray(out3), np.asarray(reference_torch(x_odd, weight, bias)),
        rtol=1e-5, atol=1e-5)

    print("KERNEL_OK")
</pallas_src>

<mosaic_0001>
module attributes {stable_mosaic.version = 11 : i64} {
  func.func @_permute_linear_kernel(%arg0: i32, %arg1: i32, %arg2: memref<6xf32, #tpu.memory_space<smem>>, %arg3: memref<1x2x128xf32, #tpu.memory_space<vmem>>, %arg4: memref<1x2x128xf32, #tpu.memory_space<vmem>>) attributes {dimension_semantics = [#tpu.dimension_semantics<parallel>, #tpu.dimension_semantics<parallel>], iteration_bounds = array<i64: 2, 1>, scalar_prefetch = 0 : i64, scratch_operands = 0 : i64, tpu.core_type = #tpu.core_type<tc>, window_params = [{transform_indices = @transform_0, window_bounds = array<i64: 6>}, {transform_indices = @transform_1, window_bounds = array<i64: 1, 2, 128>}, {transform_indices = @transform_2, window_bounds = array<i64: 1, 2, 128>}]} {
    %c0 = arith.constant 0 : index
    %0 = memref.load %arg2[%c0] : memref<6xf32, #tpu.memory_space<smem>>
    %c1 = arith.constant 1 : index
    %1 = memref.load %arg2[%c1] : memref<6xf32, #tpu.memory_space<smem>>
    %c2 = arith.constant 2 : index
    %2 = memref.load %arg2[%c2] : memref<6xf32, #tpu.memory_space<smem>>
    %c3 = arith.constant 3 : index
    %3 = memref.load %arg2[%c3] : memref<6xf32, #tpu.memory_space<smem>>
    %c4 = arith.constant 4 : index
    %4 = memref.load %arg2[%c4] : memref<6xf32, #tpu.memory_space<smem>>
    %c5 = arith.constant 5 : index
    %5 = memref.load %arg2[%c5] : memref<6xf32, #tpu.memory_space<smem>>
    %c0_0 = arith.constant 0 : index
    %c0_1 = arith.constant 0 : index
    %c0_2 = arith.constant 0 : index
    %6 = vector.load %arg3[%c0_0, %c0_1, %c0_2] : memref<1x2x128xf32, #tpu.memory_space<vmem>>, vector<1x2x128xf32>
    %7 = vector.shape_cast %6 : vector<1x2x128xf32> to vector<2x128xf32>
    %8 = vector.extract_strided_slice %7 {offsets = [0, 0], sizes = [1, 128], strides = [1, 1]} : vector<2x128xf32> to vector<1x128xf32>
    %9 = vector.extract_strided_slice %7 {offsets = [1, 0], sizes = [1, 128], strides = [1, 1]} : vector<2x128xf32> to vector<1x128xf32>
    %10 = vector.broadcast %0 : f32 to vector<1x128xf32>
    %11 = arith.mulf %10, %8 : vector<1x128xf32>
    %12 = vector.broadcast %1 : f32 to vector<1x128xf32>
    %13 = arith.mulf %12, %9 : vector<1x128xf32>
    %14 = arith.addf %11, %13 : vector<1x128xf32>
    %15 = vector.broadcast %4 : f32 to vector<1x128xf32>
    %16 = arith.addf %14, %15 : vector<1x128xf32>
    %c0_3 = arith.constant 0 : index
    %c0_4 = arith.constant 0 : index
    %c0_5 = arith.constant 0 : index
    %17 = vector.load %arg4[%c0_3, %c0_4, %c0_5] : memref<1x2x128xf32, #tpu.memory_space<vmem>>, vector<1x1x128xf32>
    %18 = vector.shape_cast %17 : vector<1x1x128xf32> to vector<1x128xf32>
    %19 = vector.shape_cast %16 : vector<1x128xf32> to vector<1x1x128xf32>
    tpu.vector_store %arg4[%c0_3, %c0_4, %c0_5], %19 {strides = array<i32>} : memref<1x2x128xf32, #tpu.memory_space<vmem>>, vector<1x1x128xf32>,
    %20 = vector.broadcast %2 : f32 to vector<1x128xf32>
    %21 = arith.mulf %20, %8 : vector<1x128xf32>
    %22 = vector.broadcast %3 : f32 to vector<1x128xf32>
    %23 = arith.mulf %22, %9 : vector<1x128xf32>
    %24 = arith.addf %21, %23 : vector<1x128xf32>
    %25 = vector.broadcast %5 : f32 to vector<1x128xf32>
    %26 = arith.addf %24, %25 : vector<1x128xf32>
    %c0_6 = arith.constant 0 : index
    %c1_7 = arith.constant 1 : index
    %c0_8 = arith.constant 0 : index
    %27 = vector.load %arg4[%c0_6, %c1_7, %c0_8] : memref<1x2x128xf32, #tpu.memory_space<vmem>>, vector<1x1x128xf32>
    %28 = vector.shape_cast %27 : vector<1x1x128xf32> to vector<1x128xf32>
    %29 = vector.shape_cast %26 : vector<1x128xf32> to vector<1x1x128xf32>
    tpu.vector_store %arg4[%c0_6, %c1_7, %c0_8], %29 {strides = array<i32>} : memref<1x2x128xf32, #tpu.memory_space<vmem>>, vector<1x1x128xf32>,
    return
  }
  func.func @transform_0(%arg0: i32, %arg1: i32) -> i32 {
    %c0_i32 = arith.constant 0 : i32
    %c0_i32_0 = arith.constant 0 : i32
    return %c0_i32 : i32
  }
  func.func @transform_1(%arg0: i32, %arg1: i32) -> (i32, i32, i32) {
    %c0_i32 = arith.constant 0 : i32
    %c0_i32_0 = arith.constant 0 : i32
    return %arg0, %c0_i32, %arg1 : i32, i32, i32
  }
  func.func @transform_2(%arg0: i32, %arg1: i32) -> (i32, i32, i32) {
    %c0_i32 = arith.constant 0 : i32
    %c0_i32_0 = arith.constant 0 : i32
    return %arg0, %c0_i32, %arg1 : i32, i32, i32
  }
}

</mosaic_0001>

<bundles_post_ra>
// kernel: permute_linear_cat.1
= control target key start
LH: loop header
LB: loop body
LE: loop exit
PB: predicated region body
PF: predicated region fallthrough
CT: control target
= control target key end

     0   :  { %7 = vsyncpa [#allocation4], 0  ;;  %s638_s0 = inlined_call_operand.vmem [shape: f32[6], index: 0, kind: input, shape index: {}]   ;;  %s639_s1 = inlined_call_operand.vmem [shape: f32[2,2,128], index: 1, kind: input, shape index: {}]   ;;  %s640_s2 = inlined_call_operand.hbm [shape: f32[2,2,128], index: 2, kind: output, shape index: {}]  }
   0x1   :  { %8 = vsyncpa [#allocation3], 0 }
   0x2   :  { %10 = vsyncpa [#allocation3 + $0x1], 0  ;;  %s505_s9 = smov 0   ;;  %s507_s10 = smov 0  }
   0x3   :  { %s509_s11 = smov 0   ;;  %s511_s12 = smov 0  }
   0x4   :  { %s513_s13 = smov 0   ;;  %s515_s14 = smov 0  }
   0x5 LB: > { %s305_s15 = sadd.s32 4294967295, %s486_s14   ;;  %s306_s16 = sadd.s32 4294967294, %s486_s14   ;;  %s486_s14 = sphi %s515_s14, %s16_s14   ;;  %s482_s13 = sphi %s513_s13, %s649_s13   ;;  %s478_s12 = sphi %s511_s12, %s648_s12   ;;  %s474_s11 = sphi %s509_s11, %s647_s11   ;;  %s470_s10 = sphi %s507_s10, %s646_s10   ;;  %s466_s9 = sphi %s505_s9, %s645_s9  }
   0x6   : > { %s28_s17 = sadd.s32 1, %s482_s13  ;;  %s86_s18 = sadd.s32 1, %s474_s11 }
   0x7   : > { %p30_p0 = scmp.ge.s32.totalorder %s28_s17, 2  ;;  %p96_p1 = scmp.ne.s32.totalorder %s474_s11, %s470_s10 }
   0x8   : > { %p97_p2 = scmp.eq.s32.totalorder %s305_s15, 1  ;;  %p102_p3 = scmp.ne.s32.totalorder %s470_s10, %s466_s9 }
   0x9   : > { %s651_s17 = smov (%p30_p0, %s28_s17), 0  ;;  %p103_p5 = scmp.eq.s32.totalorder %s306_s16, 1 }
   0xa   : > { %p545_p4 = por %p97_p2, %p96_p1  ;;  %s81_s20 = ssub.s32 %s482_s13, %s651_s17 }
   0xb   : > { %p307_p6 = scmp.ge.s32.totalorder %s486_s14, 1  ;;  %p84_p7 = scmp.eq.s32.totalorder %s81_s20, 0 }
   0xc   : > { %p552_p8 = por %p103_p5, %p102_p3  ;;  %p110_p9 = scmp.lt.s32.totalorder %s486_s14, 3 }
   0xd   : > { %s558_s22 = scalar_select %p84_p7, %s474_s11, %s86_s18  }
   0xe   : > { %p560_p10 = pnand %p307_p6, %p110_p9  ;;  %p564_p11 = scmp.eq.s32.totalorder %s305_s15, 0 }
   0xf   : > { %s123_s27 = sshll.u32 %s638_s0, 4  ;;  %s124_s27 = int_to_ptr.vmem [resolvable:$true] %s123_s27 }
  0x10   : > { %p329_p12 = pneg %p560_p10  ;;  %s389_s28 = scalar_lea.vmem %s124_s27, 16 }
  0x11   : > { %p390_p0 = scmp.ne.s32.totalorder %s124_s27, %s389_s28  ;;  %p397_p5 = scmp.lt.s32.totalorder %s124_s27, %s124_s27 }
  0x12   : > { %p330_p13 = pnand %p564_p11, %p329_p12  ;;  %p398_p6 = scmp.lt.s32.totalorder %s389_s28, %s389_s28 }
  0x14   : > { %p391_p1 = pneg %p330_p13  ;;  %p399_p7 = por %p398_p6, %p397_p5 }
  0x16   : > { %p392_p2 = pnand %p391_p1, %p390_p0 }
  0x18   : > { %p393_p3 = pneg %p392_p2 }
  0x1a   : > { %p400_p9 = pnand %p399_p7, %p393_p3 }
  0x1c   : > { %403 = shalt.err (!%p400_p9)
}
  0x1d   : > { %s488_s29 = smov [#allocation2]   ;;  %146 = sbr.rel (%p560_p10) target bundleno = 71 (0x47), region = 28 }
  0x1e   : > { %332 = dma.vmem_to_smem (!%p330_p13), %s124_s27, 16, %s488_s29, [#allocation4]  }
  0x24   : > { %457 = dma.done.wait (%p564_p11), [#allocation4], 16  }
  0x25   : > { %459 = vsyncadd (%p564_p11), [#allocation4], 4294967280 }
  0x26   : > { %152 = sfence }
  0x27   : > { %p171_p12 = scmp.lt.s32.totalorder %s478_s12, 1  ;;  %s178_s30 = sld [smem:[#allocation2]] }
  0x28   : > { %s314_s3 = sld [smem:[#allocation2 + $0x1]]  ;;  %s317_s5 = sld [smem:[#allocation2 + $0x4]] }
  0x29   : > { %s172_s4 = scalar_select %p171_p12, %s478_s12, 1 }
  0x2a   : > { %s315_s16 = sld [smem:[#allocation2 + $0x2]]  ;;  %s316_s18 = sld [smem:[#allocation2 + $0x3]] }
  0x2b   : > { %s313_s6 = sshll.u32 %s172_s4, 1  ;;  %s168_s20 = sand.u32 1, %s470_s10  }
  0x2c   : > { %s177_s15 = scalar_lea.vmem %s639_s1, %s313_s6  ;;  %s318_s23 = sld [smem:[#allocation2 + $0x5]] }
  0x2d   : > { %v184_v0 = vld [vmem:[%s177_s15] sm:$0x3]  ;;  %v185_v1 = vstv %s178_s30  ;;  %s312_s24 = sshll.u32 %s168_s20, 1  ;;  %s320_s27 = sshll.u32 %s478_s12, 5 }
  0x2e   : > { %v187_v2 = vstv %s314_s3  ;;  %v186_v3 = vmul.f32 %v185_v1, %v184_v0  ;;  %v193_v6 = vstv %s317_s5  ;;  %s170_s25 = scalar_lea.vmem [#allocation5], %s312_s24  ;;  %s593_s30 = scalar_lea.hbm %s640_s2, %s320_s27 }
  0x2f   : > { %v188_v4 = vmul.f32 %v187_v2, %v184_v0  ;;  %s222_s26 = sshll.u32 %s170_s25, 4  ;;  %s208_s3 = scalar_lea.sflag [#allocation3], %s168_s20  ;;  %s588_s26 = int_to_ptr.vmem [resolvable:$true] %s222_s26 }
  0x30   : > { %v196_v8 = vstv %s315_s16  ;;  %v198_v9 = vstv %s316_s18  ;;  %s404_s4 = scalar_lea.vmem %s588_s26, 32  ;;  %s489_s12 = smov [#allocation5]  }
  0x31   : > { %v190_v5 = vrot.slane %v188_v4, 1  ;;  %v197_v10 = vmul.f32 %v196_v8, %v184_v0  ;;  %v199_v11 = vmul.f32 %v198_v9, %v184_v0  ;;  %p405_p10 = scmp.ne.s32.totalorder %s588_s26, %s404_s4  ;;  %s408_s5 = sshll.u32 %s489_s12, 4  ;;  %s409_s5 = int_to_ptr.vmem [resolvable:$false] %s408_s5 }
  0x32   : > { %v204_v14 = vstv %s318_s23  ;;  %s410_s6 = scalar_lea.vmem %s409_s5, 64  ;;  %p411_p0 = scmp.lt.s32.totalorder %s588_s26, %s409_s5 }
  0x33   : > { %v192_v7 = vadd.f32 %v190_v5, %v186_v3  ;;  %v201_v13 = vrot.slane %v199_v11, 1  ;;  %p406_p11 = pnand %p405_p10, %p545_p4  ;;  %p412_p1 = scmp.lt.s32.totalorder %s410_s6, %s404_s4 }
  0x35   : > { %v194_v12 = vadd.f32 %v193_v6, %v192_v7  ;;  %v203_v15 = vadd.f32 %v201_v13, %v197_v10  ;;  %p407_p13 = pneg %p406_p11  ;;  %p413_p2 = por %p412_p1, %p411_p0 }
  0x37   : > { %195 = vst [vmem:[%s170_s25] sm:$0x1] %v194_v12  ;;  %v205_v16 = vadd.f32 %v204_v14, %v203_v15  ;;  %p414_p3 = pnand %p413_p2, %p407_p13 }
  0x39   : > { %206 = vst [vmem:[%s170_s25 + $0x1] sm:$0x1] %v205_v16 }
  0x3a   : > { %417 = shalt.err (!%p414_p3)
}
  0x3b   : > { %s418_s7 = scalar_lea.hbm %s593_s30, 32  ;;  %s422_s16 = scalar_lea.hbm %s640_s2, 64 }
  0x3c   : > { %p419_p5 = scmp.ne.s32.totalorder %s593_s30, %s418_s7  ;;  %p423_p9 = scmp.lt.u32.totalorder %s593_s30, %s640_s2 }
  0x3d   : > { %p424_p12 = scmp.lt.u32.totalorder %s422_s16, %s418_s7  ;;  %p426_p11 = scmp.lt.u32.totalorder %s418_s7, %s593_s30 }
  0x3e   : > { %p420_p6 = pnand %p419_p5, %p545_p4 }
  0x3f   : > { %p425_p10 = por %p424_p12, %p423_p9 }
  0x40   : > { %p421_p7 = pneg %p420_p6 }
  0x41   : > { %p427_p13 = por %p426_p11, %p425_p10 }
  0x43   : > { %p428_p0 = pnand %p427_p13, %p421_p7 }
  0x45   : > { %431 = shalt.err (!%p428_p0)
}
  0x46   : > { %327 = dma.vmem_to_hbm [thread:$0]  (%p545_p4), %s588_s26, 32, %s593_s30, %s208_s3  }
  0x47 PF: > { %p339_p1 = scmp.ge.s32.totalorder %s486_s14, 2  ;;  %s234_s23 = sand.u32 1, %s466_s9  }
  0x48   : > { %s235_s24 = scalar_lea.sflag [#allocation3], %s234_s23 }
  0x49   : > { %p334_p2 = pnand %p339_p1, %p552_p8 }
  0x4b   : > { %461 = dma.done.wait (!%p334_p2), %s235_s24, 32  }
  0x4c   : > { %463 = vsyncadd (!%p334_p2), %s235_s24, 4294967264  ;;  %s16_s14 = sadd.s32 1, %s486_s14   ;;  %s645_s9 = smov %s470_s10 }
  0x4d   : > { %p13_p3 = scmp.ge.s32.totalorder %s16_s14, 4   ;;  %s646_s10 = smov %s474_s11 }
  0x4e   : > { %s647_s11 = smov %s558_s22  ;;  %s648_s12 = smov %s482_s13 }
  0x4f   : > { %s649_s13 = smov %s651_s17  ;;  %15 = sbr.rel (!%p13_p3) target bundleno = 5 (0x5), region = 68 }
  0x56   :  { %240 = vsyncpa [#allocation3], 1 }
  0x57   :  { %242 = vsyncpa [#allocation3 + $0x1], 1 }
  0x58   :  { %243 = vsyncpa [#allocation4], 1 }
  0x59   :  { %245 = vsyncpa [#allocation4 + $0x1], 1 }

</bundles_post_ra>
